<compile_context>
chip_gen: v6e
topology: v6e:2x2x1
jax: 0.10.0
libtpu: 0.0.40
codegen_flags: <defaults>
</compile_context>

<pallas_src>
import jax
import jax.numpy as jnp
import numpy as np
from jax.experimental import pallas as pl
from jax.experimental.pallas import tpu as pltpu


def single_pixel_kernel(x_ref,
                        w1_ref, b1_ref,
                        w2_ref, b2_ref,
                        w3_ref, b3_ref,
                        o_ref):
    """One tile of pixels (channel-major) through conv1x1+ReLU x2 -> conv1x1.

    x_ref:  (Cin,  TILE) pixels tile
    w*_ref: (Cout, Cin)  BN-folded weights
    b*_ref: (Cout, 1)    BN-folded biases (broadcast across pixels)
    o_ref:  (Cout, TILE) lane-dense output tile
    """
    x = x_ref[...].astype(jnp.float32)                         # (Cin, TILE)

    # Layer 1: conv1x1 (+ folded BN) + ReLU.
    h = jnp.dot(w1_ref[...], x, preferred_element_type=jnp.float32) + b1_ref[...]
    h = jnp.maximum(h, 0.0)

    # Layer 2: conv1x1 (+ folded BN) + ReLU.
    h = jnp.dot(w2_ref[...], h, preferred_element_type=jnp.float32) + b2_ref[...]
    h = jnp.maximum(h, 0.0)

    # Layer 3: final conv1x1 (no BN / ReLU).
    o_ref[...] = (jnp.dot(w3_ref[...], h, preferred_element_type=jnp.float32)
                  + b3_ref[...]).astype(o_ref.dtype)


def single_pixel_forward(x_nchw, folded_params, *, tile_pixels=2048, io_dtype=None):
    """SinglePixel forward.  x_nchw: (N, Cin, H, W) -> (N, Cout, H, W)."""
    (w1, b1, w2, b2, w3, b3) = folded_params
    N, Cin, H, W = x_nchw.shape
    Cout = w3.shape[0]
    rows = N * H * W

    # NCHW -> channel-major (Cin, N*H*W): only swaps the small N/C axes
    # (no NHWC round trip through HBM).
    x2d = jnp.transpose(x_nchw, (1, 0, 2, 3)).reshape(Cin, rows)
    if io_dtype is not None:
        x2d = x2d.astype(io_dtype)

    # Lane-dense pixel tiles (multiple of 128), clamped to the problem size so
    # small inputs use a single block.  No host-side padding: the final partial
    # block (if any) is masked by Pallas and never written back.
    tile_pixels = max(128, min(int(tile_pixels),
                               ((rows + 127) // 128) * 128))
    grid = (pl.cdiv(rows, tile_pixels),)

    pix_in_spec = pl.BlockSpec((Cin, tile_pixels), lambda i: (0, i))
    pix_out_spec = pl.BlockSpec((Cout, tile_pixels), lambda i: (0, i))

    def full_spec(a):
        return pl.BlockSpec(a.shape, lambda i: (0, 0))

    # NOTE: with these channel counts a tile is only a few hundred KiB, far
    # below any scoped-VMEM default; raise vmem_limit_bytes only if
    # tile_pixels is pushed toward ~64K+ pixels.
    out2d = pl.pallas_call(
        single_pixel_kernel,
        out_shape=jax.ShapeDtypeStruct((Cout, rows), x2d.dtype),
        grid_spec=pltpu.PrefetchScalarGridSpec(
            num_scalar_prefetch=0,
            grid=grid,
            in_specs=[
                pix_in_spec,
                full_spec(w1), full_spec(b1),
                full_spec(w2), full_spec(b2),
                full_spec(w3), full_spec(b3),
            ],
            out_specs=pix_out_spec,
        ),
        compiler_params=pltpu.CompilerParams(
            dimension_semantics=("parallel",)),
    )(x2d, w1, b1, w2, b2, w3, b3)

    # (Cout, N*H*W) -> NCHW
    out = jnp.transpose(out2d.reshape(Cout, N, H, W), (1, 0, 2, 3))
    return out.astype(x_nchw.dtype)


def init_params(key, in_channels, out_channels, mid_layer_depth):
    """Deterministic params in PyTorch-equivalent form (conv + BN at defaults)."""
    def conv_init(k, cin, cout):
        kw, kb = jax.random.split(k)
        bound = 1.0 / np.sqrt(cin)                 # kernel_size=1 -> fan_in = cin
        w = jax.random.uniform(kw, (cout, cin), jnp.float32, -bound, bound)
        b = jax.random.uniform(kb, (cout,), jnp.float32, -bound, bound)
        return w, b

    k1, k2, k3 = jax.random.split(key, 3)
    cmid = mid_layer_depth
    bn_default = (jnp.ones((cmid,), jnp.float32),    # gamma
                  jnp.zeros((cmid,), jnp.float32),   # beta
                  jnp.zeros((cmid,), jnp.float32),   # running_mean
                  jnp.ones((cmid,), jnp.float32))    # running_var
    return {
        "conv1": conv_init(k1, in_channels, cmid),
        "bn1": bn_default,
        "conv2": conv_init(k2, cmid, cmid),
        "bn2": bn_default,
        "conv3": conv_init(k3, cmid, out_channels),
    }


def fold_bn(raw, eps=1e-5):
    """Fold eval-mode BatchNorm into the preceding conv (exact)."""
    def fold(conv, bn):
        w, b = conv
        gamma, beta, rmean, rvar = bn
        scale = gamma / jnp.sqrt(rvar + eps)       # per output channel
        shift = beta - rmean * scale
        wf = w * scale[:, None]
        bf = (b * scale + shift)[:, None]          # (Cout, 1) for lane broadcast
        return wf, bf

    w1, b1 = fold(raw["conv1"], raw["bn1"])
    w2, b2 = fold(raw["conv2"], raw["bn2"])
    w3, b3 = raw["conv3"][0], raw["conv3"][1][:, None]
    return (w1, b1, w2, b2, w3, b3)


def reference_forward(x_nchw, raw, eps=1e-5):
    """Pure-JAX reference mirroring the PyTorch module in eval mode."""
    def conv1x1(h, w, b):
        return jnp.einsum("oc,nchw->nohw", w, h) + b[None, :, None, None]

    def bn(h, gamma, beta, rmean, rvar):
        inv = gamma / jnp.sqrt(rvar + eps)
        return (h - rmean[None, :, None, None]) * inv[None, :, None, None] \
            + beta[None, :, None, None]

    h = jax.nn.relu(bn(conv1x1(x_nchw, *raw["conv1"]), *raw["bn1"]))
    h = jax.nn.relu(bn(conv1x1(h, *raw["conv2"]), *raw["bn2"]))
    return conv1x1(h, *raw["conv3"])


if __name__ == "__main__":
    in_channels, out_channels, num_layers = 4, 8, 3
    mid_layer_depth = max(in_channels, out_channels)   # module default

    key = jax.random.PRNGKey(0)
    kx, kp = jax.random.split(key)
    x = jax.random.normal(kx, (2, in_channels, 16, 16), jnp.float32)   # NCHW

    raw = init_params(kp, in_channels, out_channels, mid_layer_depth)
    params = fold_bn(raw)

    out = jax.block_until_ready(single_pixel_forward(x, params))
    ref = jax.block_until_ready(reference_forward(x, raw))

    assert out.shape == (2, out_channels, 16, 16)
    assert np.allclose(np.asarray(out), np.asarray(ref), rtol=1e-4, atol=1e-4)

    print("KERNEL_OK")
</pallas_src>

<mosaic_0001>
module attributes {stable_mosaic.version = 11 : i64} {
  func.func @single_pixel_kernel(%arg0: i32, %arg1: memref<4x512xf32, #tpu.memory_space<vmem>>, %arg2: memref<8x4xf32, #tpu.memory_space<vmem>>, %arg3: memref<8x1xf32, #tpu.memory_space<vmem>>, %arg4: memref<8x8xf32, #tpu.memory_space<vmem>>, %arg5: memref<8x1xf32, #tpu.memory_space<vmem>>, %arg6: memref<8x8xf32, #tpu.memory_space<vmem>>, %arg7: memref<8x1xf32, #tpu.memory_space<vmem>>, %arg8: memref<8x512xf32, #tpu.memory_space<vmem>>) attributes {dimension_semantics = [#tpu.dimension_semantics<parallel>], iteration_bounds = array<i64: 1>, scalar_prefetch = 0 : i64, scratch_operands = 0 : i64, tpu.core_type = #tpu.core_type<tc>, window_params = [{transform_indices = @transform_0, window_bounds = array<i64: 4, 512>}, {pipeline_mode = #tpu.pipeline_mode<synchronous>, transform_indices = @transform_1, window_bounds = array<i64: 8, 4>}, {pipeline_mode = #tpu.pipeline_mode<synchronous>, transform_indices = @transform_2, window_bounds = array<i64: 8, 1>}, {pipeline_mode = #tpu.pipeline_mode<synchronous>, transform_indices = @transform_3, window_bounds = array<i64: 8, 8>}, {pipeline_mode = #tpu.pipeline_mode<synchronous>, transform_indices = @transform_4, window_bounds = array<i64: 8, 1>}, {pipeline_mode = #tpu.pipeline_mode<synchronous>, transform_indices = @transform_5, window_bounds = array<i64: 8, 8>}, {pipeline_mode = #tpu.pipeline_mode<synchronous>, transform_indices = @transform_6, window_bounds = array<i64: 8, 1>}, {transform_indices = @transform_7, window_bounds = array<i64: 8, 512>}]} {
    %c0 = arith.constant 0 : index
    %c0_0 = arith.constant 0 : index
    %0 = vector.load %arg1[%c0, %c0_0] : memref<4x512xf32, #tpu.memory_space<vmem>>, vector<4x512xf32>
    %c0_1 = arith.constant 0 : index
    %c0_2 = arith.constant 0 : index
    %1 = vector.load %arg2[%c0_1, %c0_2] : memref<8x4xf32, #tpu.memory_space<vmem>>, vector<8x4xf32>
    %cst = arith.constant dense<0.000000e+00> : vector<8x512xf32>
    %2 = tpu.matmul %1, %0, %cst {dimension_numbers = #tpu.dot_dimension_numbers<[1], [0], [0], [1], [0, 0, 1, 1], [], []>} : vector<8x4xf32>, vector<4x512xf32>, vector<8x512xf32> -> vector<8x512xf32>
    %c0_3 = arith.constant 0 : index
    %c0_4 = arith.constant 0 : index
    %3 = vector.load %arg3[%c0_3, %c0_4] : memref<8x1xf32, #tpu.memory_space<vmem>>, vector<8x1xf32>
    %4 = vector.broadcast %3 : vector<8x1xf32> to vector<8x512xf32>
    %5 = arith.addf %2, %4 : vector<8x512xf32>
    %cst_5 = arith.constant 0.000000e+00 : f32
    %6 = vector.broadcast %cst_5 : f32 to vector<8x512xf32>
    %7 = arith.maximumf %5, %6 : vector<8x512xf32>
    %c0_6 = arith.constant 0 : index
    %c0_7 = arith.constant 0 : index
    %8 = vector.load %arg4[%c0_6, %c0_7] : memref<8x8xf32, #tpu.memory_space<vmem>>, vector<8x8xf32>
    %cst_8 = arith.constant dense<0.000000e+00> : vector<8x512xf32>
    %9 = tpu.matmul %8, %7, %cst_8 {dimension_numbers = #tpu.dot_dimension_numbers<[1], [0], [0], [1], [0, 0, 1, 1], [], []>} : vector<8x8xf32>, vector<8x512xf32>, vector<8x512xf32> -> vector<8x512xf32>
    %c0_9 = arith.constant 0 : index
    %c0_10 = arith.constant 0 : index
    %10 = vector.load %arg5[%c0_9, %c0_10] : memref<8x1xf32, #tpu.memory_space<vmem>>, vector<8x1xf32>
    %11 = vector.broadcast %10 : vector<8x1xf32> to vector<8x512xf32>
    %12 = arith.addf %9, %11 : vector<8x512xf32>
    %cst_11 = arith.constant 0.000000e+00 : f32
    %13 = vector.broadcast %cst_11 : f32 to vector<8x512xf32>
    %14 = arith.maximumf %12, %13 : vector<8x512xf32>
    %c0_12 = arith.constant 0 : index
    %c0_13 = arith.constant 0 : index
    %15 = vector.load %arg6[%c0_12, %c0_13] : memref<8x8xf32, #tpu.memory_space<vmem>>, vector<8x8xf32>
    %cst_14 = arith.constant dense<0.000000e+00> : vector<8x512xf32>
    %16 = tpu.matmul %15, %14, %cst_14 {dimension_numbers = #tpu.dot_dimension_numbers<[1], [0], [0], [1], [0, 0, 1, 1], [], []>} : vector<8x8xf32>, vector<8x512xf32>, vector<8x512xf32> -> vector<8x512xf32>
    %c0_15 = arith.constant 0 : index
    %c0_16 = arith.constant 0 : index
    %17 = vector.load %arg7[%c0_15, %c0_16] : memref<8x1xf32, #tpu.memory_space<vmem>>, vector<8x1xf32>
    %18 = vector.broadcast %17 : vector<8x1xf32> to vector<8x512xf32>
    %19 = arith.addf %16, %18 : vector<8x512xf32>
    %c0_17 = arith.constant 0 : index
    %c0_18 = arith.constant 0 : index
    %20 = vector.load %arg8[%c0_17, %c0_18] : memref<8x512xf32, #tpu.memory_space<vmem>>, vector<8x512xf32>
    tpu.vector_store %arg8[%c0_17, %c0_18], %19 {strides = array<i32>} : memref<8x512xf32, #tpu.memory_space<vmem>>, vector<8x512xf32>,
    return
  }
  func.func @transform_0(%arg0: i32) -> (i32, i32) {
    %c0_i32 = arith.constant 0 : i32
    %c0_i32_0 = arith.constant 0 : i32
    return %c0_i32, %arg0 : i32, i32
  }
  func.func @transform_1(%arg0: i32) -> (i32, i32) {
    %c0_i32 = arith.constant 0 : i32
    %c0_i32_0 = arith.constant 0 : i32
    %c0_i32_1 = arith.constant 0 : i32
    return %c0_i32, %c0_i32_0 : i32, i32
  }
  func.func @transform_2(%arg0: i32) -> (i32, i32) {
    %c0_i32 = arith.constant 0 : i32
    %c0_i32_0 = arith.constant 0 : i32
    %c0_i32_1 = arith.constant 0 : i32
    return %c0_i32, %c0_i32_0 : i32, i32
  }
  func.func @transform_3(%arg0: i32) -> (i32, i32) {
    %c0_i32 = arith.constant 0 : i32
    %c0_i32_0 = arith.constant 0 : i32
    %c0_i32_1 = arith.constant 0 : i32
    return %c0_i32, %c0_i32_0 : i32, i32
  }
  func.func @transform_4(%arg0: i32) -> (i32, i32) {
    %c0_i32 = arith.constant 0 : i32
    %c0_i32_0 = arith.constant 0 : i32
    %c0_i32_1 = arith.constant 0 : i32
    return %c0_i32, %c0_i32_0 : i32, i32
  }
  func.func @transform_5(%arg0: i32) -> (i32, i32) {
    %c0_i32 = arith.constant 0 : i32
    %c0_i32_0 = arith.constant 0 : i32
    %c0_i32_1 = arith.constant 0 : i32
    return %c0_i32, %c0_i32_0 : i32, i32
  }
  func.func @transform_6(%arg0: i32) -> (i32, i32) {
    %c0_i32 = arith.constant 0 : i32
    %c0_i32_0 = arith.constant 0 : i32
    %c0_i32_1 = arith.constant 0 : i32
    return %c0_i32, %c0_i32_0 : i32, i32
  }
  func.func @transform_7(%arg0: i32) -> (i32, i32) {
    %c0_i32 = arith.constant 0 : i32
    %c0_i32_0 = arith.constant 0 : i32
    return %c0_i32, %arg0 : i32, i32
  }
}

</mosaic_0001>

<bundles_post_ra>
// kernel: tpu_custom_call.1
= control target key start
LH: loop header
LB: loop body
LE: loop exit
PB: predicated region body
PF: predicated region fallthrough
CT: control target
= control target key end

     0   :  { %vm44_vm0 = vcmask 1043456   ;;  %v565_v4 = vmov 0.0   ;;  %s643_s0 = inlined_call_operand.vmem [shape: f32[4,512], index: 0, kind: input, shape index: {}]   ;;  %s644_s1 = inlined_call_operand.vmem [shape: f32[8,4], index: 1, kind: input, shape index: {}]   ;;  %s645_s2 = inlined_call_operand.vmem [shape: f32[8,1], index: 2, kind: input, shape index: {}]   ;;  %s646_s3 = inlined_call_operand.vmem [shape: f32[8,8], index: 3, kind: input, shape index: {}]   ;;  %s647_s4 = inlined_call_operand.vmem [shape: f32[8,1], index: 4, kind: input, shape index: {}]   ;;  %s648_s5 = inlined_call_operand.vmem [shape: f32[8,8], index: 5, kind: input, shape index: {}]   ;;  %s649_s6 = inlined_call_operand.vmem [shape: f32[8,1], index: 6, kind: input, shape index: {}]   ;;  %s650_s7 = inlined_call_operand.hbm [shape: f32[8,512], index: 7, kind: output, shape index: {}]  }
   0x1   :  { %v27_v0 = vld [vmem:[%s643_s0] sm:$0xff]  ;;  %v28_v1 = vld [vmem:[%s643_s0 + $0x8] sm:$0xff]  ;;  %117 = vmatprep.mubr.f32.mxu0 %v565_v4  ;;  %188 = vmatprep.mubr.f32.mxu1 %v565_v4 }
   0x2   :  { %v38_v2 = vcombine.high %v27_v0, %v27_v0  ;;  %v39_v3 = vcombine.high %v28_v1, %v28_v1 }
   0x3   :  { %12 = vsyncpa [#allocation3], 0  ;;  %v29_v5 = vld [vmem:[%s644_s1] sm:$0xff]  ;;  %vm40_vm1 = vcmask 31744   ;;  %v566_v6 = vmov 0   ;;  %vm206_vm2 = vcmask 64512  }
   0x4   :  { %539 = vset.pattern.permute.xlu0 %v566_v6  ;;  %540 = vset.pattern.permute.xlu1 %v566_v6  ;;  %v30_v7 = vld [vmem:[%s645_s2] sm:$0xff] }
   0x5   :  { %526 = vmatprep.subr.msk.mxu0 %vm44_vm0, %v38_v2  ;;  %529 = vmatprep.subr.msk.mxu1 %vm44_vm0, %v39_v3  ;;  %v200_v8 = vld [vmem:[%s647_s4] sm:$0xff] }
   0x6   :  { %527 = vmatpush1.msk.msra.mxu0 %vm44_vm0, %v27_v0  ;;  %530 = vmatpush1.msk.msra.mxu1 %vm44_vm0, %v28_v1  ;;  %v199_v22 = vld [vmem:[%s646_s3] sm:$0xff] }
   0x7   :  { %528 = vmatmul.mubr.msk.f32.vlgmr.msra.gmra.mxu0 %vm40_vm1, %v29_v5  ;;  %531 = vmatmul.mubr.msk.f32.vlgmr.msra.gmra.mxu1 %vm40_vm1, %v29_v5  ;;  %v357_v23 = vld [vmem:[%s649_s6] sm:$0xff]  ;;  %s567_s6 = smov [#allocation2]  }
   0x8   :  { %33 = vperm.xlu0 %539, %v30_v7   ;;  %274 = vmatprep.mubr.f32.mxu0 %v565_v4  ;;  %v356_v37 = vld [vmem:[%s648_s5] sm:$0xff]  ;;  %s518_s12 = sshll.u32 %s567_s6, 4  ;;  %s519_s12 = int_to_ptr.vmem [resolvable:$true] %s518_s12 }
   0x9   :  { %345 = vmatprep.mubr.f32.mxu1 %v565_v4  ;;  %360 = vperm.xlu1 %540, %v357_v23   ;;  %s543_s5 = scalar_lea.vmem %s519_s12, 512  ;;  %p548_p1 = scmp.lt.s32.totalorder %s519_s12, %s519_s12 }
   0xa   :  { %p544_p0 = scmp.ne.s32.totalorder %s519_s12, %s543_s5  ;;  %p549_p2 = scmp.lt.s32.totalorder %s543_s5, %s543_s5 }
   0xc   :  { %203 = vperm.xlu0 %539, %v200_v8   ;;  %p550_p3 = por %p549_p2, %p548_p1 }
   0xe   :  { %p551_p4 = pnand %p550_p3, %p544_p0 }
  0x83   :  { %v34_v11 = vpop.permute.xlu0 %33 }
  0x84   :  { %v361_v38 = vpop.permute.xlu1 %360 }
  0x87   :  { %v204_v26 = vpop.permute.xlu0 %203 }
  0xc7   :  { %v119_v9 = vpop.f32.mrf.mxu0  ;;  %v190_v10 = vpop.f32.mrf.mxu1 }
  0xc8   :  { %v120_v12 = vadd.f32 %v119_v9, %v34_v11  ;;  %v191_v13 = vadd.f32 %v190_v10, %v34_v11 }
  0xc9   :  { %v121_v14 = vpop.f32.mrf.mxu0  ;;  %v192_v15 = vpop.f32.mrf.mxu1 }
  0xca   :  { %v122_v16 = vadd.f32 %v121_v14, %v34_v11  ;;  %v193_v17 = vadd.f32 %v192_v15, %v34_v11  ;;  %v195_v20 = vmax.f32 %v120_v12, 0.0  ;;  %v197_v21 = vmax.f32 %v191_v13, 0.0 }
  0xcc   :  { %v196_v18 = vmax.f32 %v122_v16, 0.0  ;;  %v198_v19 = vmax.f32 %v193_v17, 0.0 }
  0xce   :  { %240 = vmatprep.subr.mxu0 %v196_v18  ;;  %311 = vmatprep.subr.mxu1 %v198_v19 }
  0xcf   :  { %241 = vmatpush1.msra.mxu0 %v195_v20  ;;  %312 = vmatpush1.msra.mxu1 %v197_v21 }
  0xd0   :  { %532 = vmatmul.mubr.msk.f32.vlgmr.msra.gmra.mxu0 %vm206_vm2, %v199_v22  ;;  %533 = vmatmul.mubr.msk.f32.vlgmr.msra.gmra.mxu1 %vm206_vm2, %v199_v22 }
  0xd1   :  { %430 = vmatprep.mubr.f32.mxu0 %v565_v4  ;;  %501 = vmatprep.mubr.f32.mxu1 %v565_v4 }
 0x190   :  { %v276_v24 = vpop.f32.mrf.mxu0  ;;  %v347_v25 = vpop.f32.mrf.mxu1 }
 0x191   :  { %v277_v27 = vadd.f32 %v276_v24, %v204_v26  ;;  %v348_v28 = vadd.f32 %v347_v25, %v204_v26 }
 0x192   :  { %v278_v29 = vpop.f32.mrf.mxu0  ;;  %v349_v30 = vpop.f32.mrf.mxu1 }
 0x193   :  { %v279_v31 = vadd.f32 %v278_v29, %v204_v26  ;;  %v350_v32 = vadd.f32 %v349_v30, %v204_v26  ;;  %v352_v35 = vmax.f32 %v277_v27, 0.0  ;;  %v354_v36 = vmax.f32 %v348_v28, 0.0 }
 0x195   :  { %v353_v33 = vmax.f32 %v279_v31, 0.0  ;;  %v355_v34 = vmax.f32 %v350_v32, 0.0 }
 0x197   :  { %396 = vmatprep.subr.mxu0 %v353_v33  ;;  %467 = vmatprep.subr.mxu1 %v355_v34 }
 0x198   :  { %397 = vmatpush1.msra.mxu0 %v352_v35  ;;  %468 = vmatpush1.msra.mxu1 %v354_v36 }
 0x199   :  { %534 = vmatmul.mubr.msk.f32.vlgmr.msra.gmra.mxu0 %vm206_vm2, %v356_v37  ;;  %535 = vmatmul.mubr.msk.f32.vlgmr.msra.gmra.mxu1 %vm206_vm2, %v356_v37 }
 0x259   :  { %v432_v39 = vpop.f32.mrf.mxu0  ;;  %v503_v40 = vpop.f32.mrf.mxu1 }
 0x25a   :  { %v433_v41 = vadd.f32 %v432_v39, %v361_v38  ;;  %v504_v42 = vadd.f32 %v503_v40, %v361_v38 }
 0x25b   :  { %v434_v43 = vpop.f32.mrf.mxu0  ;;  %v505_v44 = vpop.f32.mrf.mxu1 }
 0x25c   :  { %508 = vst [vmem:[#allocation2] sm:$0xff] %v433_v41  ;;  %510 = vst [vmem:[#allocation2 + $0x10] sm:$0xff] %v504_v42  ;;  %v435_v45 = vadd.f32 %v434_v43, %v361_v38  ;;  %v506_v46 = vadd.f32 %v505_v44, %v361_v38 }
 0x25e   :  { %509 = vst [vmem:[#allocation2 + $0x8] sm:$0xff] %v435_v45  ;;  %511 = vst [vmem:[#allocation2 + $0x18] sm:$0xff] %v506_v46 }
 0x25f   :  { %554 = shalt.err (!%p551_p4)
}
 0x260   :  { %521 = dma.vmem_to_hbm [thread:$0]  %s519_s12, 512, %s650_s7, [#allocation3]  }
 0x261   :  { %563 = dma.done.wait [#allocation3], 512  }
 0x262   :  { %564 = vsyncadd [#allocation3], 4294966784 }
 0x263   :  { %525 = vsyncpa [#allocation3], 1 }

</bundles_post_ra>
